<compile_context>
chip_gen: v7x
topology: tpu7x:2x2x1
jax: 0.10.0
libtpu: 0.0.40
codegen_flags: <defaults>
</compile_context>

<pallas_src>
import numpy as np
import jax
import jax.numpy as jnp
from jax import lax
from jax.experimental import pallas as pl
from jax.experimental.pallas import tpu as pltpu

_MASK_BIAS = -1e30  # finite "-inf": exp() underflows to exactly 0, never NaN


def _round_up(x, m):
    return ((x + m - 1) // m) * m


def _vmem_capacity_bytes():
    """Per-TensorCore VMEM capacity from the device kind (conservative fallback)."""
    try:
        kind = jax.devices()[0].device_kind.lower()
    except Exception:
        return 64 * 1024 * 1024
    if "v2" in kind or "v3" in kind:
        return 16 * 1024 * 1024
    if "7" in kind:                       # v7x: 64 MiB per TensorCore
        return 64 * 1024 * 1024
    return 128 * 1024 * 1024              # v4 / v5e / v5p / v6e


# ----------------------------- Pallas kernel --------------------------------
def ai2v_kernel(v_ref, u_ref, bias_ref,
                AtW_ref, Atb_ref, AcW_ref, Acb_ref,
                BcW_ref, Bcb_ref, RW_ref, Rb_ref,
                out_ref):
    BB, _, Mp = bias_ref.shape            # (block_b, 1, Mp)
    E = v_ref.shape[1]
    Tp = v_ref.shape[0] // BB
    D = AtW_ref.shape[1]                  # padded d_alpha
    NE = RW_ref.shape[1]
    cdt = v_ref.dtype                     # MXU operand dtype (f32 or bf16)

    # Linear layers as flat 2D matmuls over pre-flattened row slabs; f32 accum.
    v2 = v_ref[...]                                                        # (BB*Tp, E)
    u2 = u_ref[...]                                                        # (BB*Mp, E)
    t_vecs = jnp.dot(v2, AtW_ref[...],
                     preferred_element_type=jnp.float32) + Atb_ref[...]    # (BB*Tp, D)
    c_vecs = jnp.dot(u2, AcW_ref[...],
                     preferred_element_type=jnp.float32) + Acb_ref[...]    # (BB*Mp, D)
    bc = jnp.dot(u2, BcW_ref[...],
                 preferred_element_type=jnp.float32) + Bcb_ref[...]        # (BB*Mp, E)

    # Minor-dim-preserving reshapes only (layout-trivial; Tp/Mp sublane-aligned).
    t3 = t_vecs.reshape(BB, Tp, D)
    c3 = c_vecs.reshape(BB, Mp, D)

    # Batched contraction over d_alpha (no materialised transpose of c_vecs).
    dots = lax.dot_general(t3, c3, (((2,), (2,)), ((0,), (0,))),
                           preferred_element_type=jnp.float32)             # (BB, Tp, Mp)

    # Cosine similarity: dots / max(||t||*||c||, 1e-6); zero-padded D columns
    # contribute nothing to dots or norms.
    t_sq = jnp.sum(t3 * t3, axis=-1, keepdims=True)                        # (BB, Tp, 1)
    c_sq = jnp.sum(c3 * c3, axis=-1)                                       # (BB, Mp)
    inv_norm = lax.rsqrt(jnp.maximum(t_sq * c_sq[:, None, :], 1e-12))
    cos = dots * inv_norm + bias_ref[...]                                  # additive mask

    # masked softmax over context positions (all f32 — v5e VPU/EUP have no bf16)
    row_max = jnp.max(cos, axis=-1, keepdims=True)
    e = jnp.exp(cos - row_max)
    attn = e * pl.reciprocal(jnp.sum(e, axis=-1, keepdims=True), approx=True)

    # alpha_j_1 = sum_m attn * Bc(u); cast operands to cdt, keep f32 accumulator.
    bc3 = bc.reshape(BB, Mp, E).astype(cdt)
    alpha = lax.dot_general(attn.astype(cdt), bc3, (((2,), (1,)), ((0,), (0,))),
                            preferred_element_type=jnp.float32)            # (BB, Tp, E)

    # z_j_1 = R(alpha_j_1) as one flattened matmul; output stays 2D (no reshape).
    z = jnp.dot(alpha.reshape(BB * Tp, E).astype(cdt), RW_ref[...],
                preferred_element_type=jnp.float32) + Rb_ref[...]          # (BB*Tp, NE)

    out_ref[...] = z.astype(out_ref.dtype)


# --------------------------- host-side weight prep ---------------------------
def prepare_params(params, *, d_alpha_pad_to=128, compute_dtype=jnp.float32):
    """One-time prep: transpose Linears to (in, out), zero-pad d_alpha to 128,
    store embeddings + weights in the MXU operand dtype. Biases stay f32."""
    d_alpha = params["AtW"].shape[0]
    D_pad = _round_up(d_alpha, d_alpha_pad_to)

    def pad_attn(W, b):
        Wt = jnp.zeros((W.shape[1], D_pad), jnp.float32).at[:, :d_alpha].set(W.T)
        bp = jnp.zeros((1, D_pad), jnp.float32).at[:, :d_alpha].set(b)
        return Wt.astype(compute_dtype), bp

    AtW, Atb = pad_attn(params["AtW"], params["Atb"])
    AcW, Acb = pad_attn(params["AcW"], params["Acb"])
    return dict(
        t_emb=params["t_emb"].astype(compute_dtype),
        c_emb=params["c_emb"].astype(compute_dtype),
        AtW=AtW, Atb=Atb, AcW=AcW, Acb=Acb,
        BcW=params["BcW"].T.astype(compute_dtype), Bcb=params["Bcb"],
        RW=params["RW"].T.astype(compute_dtype), Rb=params["Rb"],
    )


def _choose_block_b(B, Tp, Mp, E, D, NE, in_itemsize, vmem_budget_bytes,
                    target_rows=512):
    """Batches per grid step: ~512 rows per flat matmul, capped by VMEM budget."""
    bb = max(1, pl.cdiv(target_rows, max(min(Tp, Mp), 1)))
    per_b = (2 * (Tp * E + Mp * E) * in_itemsize       # double-buffered v/u blocks
             + 2 * Mp * 4                              # double-buffered bias block
             + 2 * Tp * NE * 4                         # double-buffered output block
             + (Tp * D + Mp * D + Mp * E) * 4          # t_vecs, c_vecs, Bc(u) (f32)
             + 3 * Tp * Mp * 4                         # cos / exp / attn (f32)
             + (Tp * E + Tp * NE) * 4)                 # alpha, z (f32)
    bb = min(bb, max(1, vmem_budget_bytes // per_b))
    return max(1, min(bb, B))


# ------------------------------ wrapper --------------------------------------
def attentive_item_to_vec(titems, citems, mask_pad_ids, prep, *, block_b=None):
    """Forward pass of AttentiveItemToVec (training path, inference=False)."""
    B, T = titems.shape
    _, M = citems.shape
    E = prep["t_emb"].shape[1]
    D = prep["AtW"].shape[1]
    NE = prep["RW"].shape[1]
    cdt = prep["AtW"].dtype
    itemsize = jnp.dtype(cdt).itemsize

    # Embedding gather (tables already stored in the operand dtype -> gathered
    # activations are half-size in HBM when bf16 is used) + compact mask bias.
    # TODO(synk): fuse this gather into the kernel via scalar-prefetched ids +
    #             per-row make_async_copy DMAs from pl.ANY embedding tables.
    v = jnp.take(prep["t_emb"], titems, axis=0)                            # (B, T, E)
    u = jnp.take(prep["c_emb"], citems, axis=0)                            # (B, M, E)
    bias = jnp.where(mask_pad_ids, _MASK_BIAS, 0.0).astype(jnp.float32)[:, None, :]

    # pad seq dims so the flat row slabs stay sublane-aligned (16 for bf16 packing)
    seq_mult = 16 if itemsize == 2 else 8
    Tp, Mp = _round_up(T, seq_mult), _round_up(M, seq_mult)
    if Tp != T:
        v = jnp.pad(v, ((0, 0), (0, Tp - T), (0, 0)))
    if Mp != M:
        u = jnp.pad(u, ((0, 0), (0, Mp - M), (0, 0)))
        bias = jnp.pad(bias, ((0, 0), (0, 0), (0, Mp - M)),
                       constant_values=_MASK_BIAS)

    vmem_cap = _vmem_capacity_bytes()
    if block_b is None:
        block_b = _choose_block_b(B, Tp, Mp, E, D, NE, itemsize,
                                  vmem_budget_bytes=vmem_cap // 2)
    # megacore-friendly: keep >= 2 grid steps so both v7x TensorCores get work
    while block_b > 1 and pl.cdiv(B, block_b) < 2:
        block_b = max(1, block_b // 2)

    Bp = _round_up(B, block_b)
    if Bp != B:
        pad = Bp - B
        v = jnp.pad(v, ((0, pad), (0, 0), (0, 0)))
        u = jnp.pad(u, ((0, pad), (0, 0), (0, 0)))
        bias = jnp.pad(bias, ((0, pad), (0, 0), (0, 0)))

    # row-contiguous 2D slabs -> simple DMAs, no in-kernel (B, S, E) merges
    v2 = v.reshape(Bp * Tp, E)
    u2 = u.reshape(Bp * Mp, E)

    def full_spec(a):
        n = a.ndim
        return pl.BlockSpec(a.shape, lambda i: (0,) * n)

    grid_spec = pltpu.PrefetchScalarGridSpec(
        num_scalar_prefetch=0,
        grid=(Bp // block_b,),
        in_specs=[
            pl.BlockSpec((block_b * Tp, E), lambda i: (i, 0)),     # v_l_j rows
            pl.BlockSpec((block_b * Mp, E), lambda i: (i, 0)),     # u_l_m rows
            pl.BlockSpec((block_b, 1, Mp), lambda i: (i, 0, 0)),   # mask bias
            full_spec(prep["AtW"]), full_spec(prep["Atb"]),
            full_spec(prep["AcW"]), full_spec(prep["Acb"]),
            full_spec(prep["BcW"]), full_spec(prep["Bcb"]),
            full_spec(prep["RW"]), full_spec(prep["Rb"]),
        ],
        out_specs=pl.BlockSpec((block_b * Tp, NE), lambda i: (i, 0)),
    )

    # advisory cost estimate so XLA overlaps the gather/pad glue with the kernel
    flops = 2 * Bp * (Tp * E * D + Mp * E * D + Mp * E * E
                      + Tp * Mp * D + Tp * Mp * E + Tp * E * NE)
    transcendentals = 2 * Bp * Tp * Mp
    weight_bytes = sum(int(prep[k].size) * jnp.dtype(prep[k].dtype).itemsize
                       for k in ("AtW", "Atb", "AcW", "Acb",
                                 "BcW", "Bcb", "RW", "Rb"))
    bytes_accessed = (int(v2.size) * itemsize + int(u2.size) * itemsize
                      + int(bias.size) * 4 + weight_bytes + Bp * Tp * NE * 4)

    out2d = pl.pallas_call(
        ai2v_kernel,
        out_shape=jax.ShapeDtypeStruct((Bp * Tp, NE), jnp.float32),
        grid_spec=grid_spec,
        compiler_params=pltpu.CompilerParams(
            dimension_semantics=("parallel",),
            vmem_limit_bytes=int(vmem_cap * 3 // 4),
        ),
        cost_estimate=pl.CostEstimate(flops=int(flops),
                                      transcendentals=int(transcendentals),
                                      bytes_accessed=int(bytes_accessed)),
    )(v2, u2, bias,
      prep["AtW"], prep["Atb"], prep["AcW"], prep["Acb"],
      prep["BcW"], prep["Bcb"], prep["RW"], prep["Rb"])

    return out2d.reshape(Bp, Tp, NE)[:B, :T, :]


# ------------------------- deterministic params -------------------------------
def init_params(key, vocab_size, embedding_size, d_alpha=60, N=1):
    ks = jax.random.split(key, 12)
    E = embedding_size

    def emb(k):
        w = jax.random.uniform(k, (vocab_size - 1, E),
                               minval=-0.5 / E, maxval=0.5 / E,
                               dtype=jnp.float32)
        return jnp.concatenate([w, jnp.zeros((1, E), jnp.float32)], axis=0)

    def linear(kw, kb, out_f, in_f):
        bound = 1.0 / np.sqrt(in_f)
        W = jax.random.uniform(kw, (out_f, in_f), minval=-bound, maxval=bound,
                               dtype=jnp.float32)
        b = jax.random.uniform(kb, (1, out_f), minval=-bound, maxval=bound,
                               dtype=jnp.float32)
        return W, b

    AtW, Atb = linear(ks[2], ks[3], d_alpha, E)
    AcW, Acb = linear(ks[4], ks[5], d_alpha, E)
    BcW, Bcb = linear(ks[6], ks[7], E, E)
    RW, Rb = linear(ks[8], ks[9], N * E, E)
    return dict(t_emb=emb(ks[0]), c_emb=emb(ks[1]),
                AtW=AtW, Atb=Atb, AcW=AcW, Acb=Acb,
                BcW=BcW, Bcb=Bcb, RW=RW, Rb=Rb)


# ---------------------------- pure-JAX reference ------------------------------
def reference(titems, citems, mask_pad_ids, p):
    v = jnp.take(p["t_emb"], titems, axis=0)
    u = jnp.take(p["c_emb"], citems, axis=0)
    t_vecs = v @ p["AtW"].T + p["Atb"]
    c_vecs = u @ p["AcW"].T + p["Acb"]
    dots = jnp.einsum("btd,bmd->btm", t_vecs, c_vecs)
    tn = jnp.linalg.norm(t_vecs, axis=-1)[:, :, None]
    cn = jnp.linalg.norm(c_vecs, axis=-1)[:, None, :]
    cos = dots / jnp.maximum(tn * cn, 1e-6)
    cos = jnp.where(mask_pad_ids[:, None, :], -jnp.inf, cos)
    attn = jax.nn.softmax(cos, axis=-1)
    bc = u @ p["BcW"].T + p["Bcb"]
    alpha = jnp.einsum("btm,bme->bte", attn, bc)
    return alpha @ p["RW"].T + p["Rb"]


# --------------------------------- main ---------------------------------------
if __name__ == "__main__":
    B, T, M = 2, 8, 16
    vocab_size, E, d_alpha, N = 50, 32, 60, 1
    padding_idx = vocab_size - 1

    key = jax.random.PRNGKey(0)
    k_par, k_t, k_c = jax.random.split(key, 3)
    params = init_params(k_par, vocab_size, E, d_alpha, N)

    titems = jax.random.randint(k_t, (B, T), 0, vocab_size - 1, dtype=jnp.int32)
    citems = jax.random.randint(k_c, (B, M), 0, vocab_size - 1, dtype=jnp.int32)
    # make the last few context items padding (but never a whole row)
    citems = citems.at[:, -3:].set(padding_idx)
    mask_pad_ids = citems == padding_idx        # (B, M) bool

    ref = reference(titems, citems, mask_pad_ids, params)

    # f32-operand path: tight check against the reference
    prep32 = prepare_params(params, compute_dtype=jnp.float32)
    out32 = jax.block_until_ready(
        attentive_item_to_vec(titems, citems, mask_pad_ids, prep32))
    np.testing.assert_allclose(np.asarray(out32), np.asarray(ref),
                               rtol=2e-3, atol=1e-3)

    # bf16-operand path (half the input DMA bytes; f32 accum/norms/softmax):
    # looser tolerance reflects bf16 operand truncation only.
    prep16 = prepare_params(params, compute_dtype=jnp.bfloat16)
    out16 = jax.block_until_ready(
        attentive_item_to_vec(titems, citems, mask_pad_ids, prep16))
    np.testing.assert_allclose(np.asarray(out16), np.asarray(ref),
                               rtol=5e-2, atol=5e-3)

    print("KERNEL_OK")
</pallas_src>

<mosaic_0001>
module attributes {stable_mosaic.version = 11 : i64} {
  func.func @ai2v_kernel(%arg0: i32, %arg1: memref<8x32xf32, #tpu.memory_space<vmem>>, %arg2: memref<16x32xf32, #tpu.memory_space<vmem>>, %arg3: memref<1x1x16xf32, #tpu.memory_space<vmem>>, %arg4: memref<32x128xf32, #tpu.memory_space<vmem>>, %arg5: memref<1x128xf32, #tpu.memory_space<vmem>>, %arg6: memref<32x128xf32, #tpu.memory_space<vmem>>, %arg7: memref<1x128xf32, #tpu.memory_space<vmem>>, %arg8: memref<32x32xf32, #tpu.memory_space<vmem>>, %arg9: memref<1x32xf32, #tpu.memory_space<vmem>>, %arg10: memref<32x32xf32, #tpu.memory_space<vmem>>, %arg11: memref<1x32xf32, #tpu.memory_space<vmem>>, %arg12: memref<8x32xf32, #tpu.memory_space<vmem>>) attributes {dimension_semantics = [#tpu.dimension_semantics<parallel>], iteration_bounds = array<i64: 2>, scalar_prefetch = 0 : i64, scratch_operands = 0 : i64, tpu.core_type = #tpu.core_type<tc>, window_params = [{transform_indices = @transform_0, window_bounds = array<i64: 8, 32>}, {transform_indices = @transform_1, window_bounds = array<i64: 16, 32>}, {transform_indices = @transform_2, window_bounds = array<i64: 1, 1, 16>}, {pipeline_mode = #tpu.pipeline_mode<synchronous>, transform_indices = @transform_3, window_bounds = array<i64: 32, 128>}, {pipeline_mode = #tpu.pipeline_mode<synchronous>, transform_indices = @transform_4, window_bounds = array<i64: 1, 128>}, {pipeline_mode = #tpu.pipeline_mode<synchronous>, transform_indices = @transform_5, window_bounds = array<i64: 32, 128>}, {pipeline_mode = #tpu.pipeline_mode<synchronous>, transform_indices = @transform_6, window_bounds = array<i64: 1, 128>}, {pipeline_mode = #tpu.pipeline_mode<synchronous>, transform_indices = @transform_7, window_bounds = array<i64: 32, 32>}, {pipeline_mode = #tpu.pipeline_mode<synchronous>, transform_indices = @transform_8, window_bounds = array<i64: 1, 32>}, {pipeline_mode = #tpu.pipeline_mode<synchronous>, transform_indices = @transform_9, window_bounds = array<i64: 32, 32>}, {pipeline_mode = #tpu.pipeline_mode<synchronous>, transform_indices = @transform_10, window_bounds = array<i64: 1, 32>}, {transform_indices = @transform_11, window_bounds = array<i64: 8, 32>}]} {
    %c0 = arith.constant 0 : index
    %c0_0 = arith.constant 0 : index
    %0 = vector.load %arg1[%c0, %c0_0] : memref<8x32xf32, #tpu.memory_space<vmem>>, vector<8x32xf32>
    %c0_1 = arith.constant 0 : index
    %c0_2 = arith.constant 0 : index
    %1 = vector.load %arg2[%c0_1, %c0_2] : memref<16x32xf32, #tpu.memory_space<vmem>>, vector<16x32xf32>
    %c0_3 = arith.constant 0 : index
    %c0_4 = arith.constant 0 : index
    %2 = vector.load %arg4[%c0_3, %c0_4] : memref<32x128xf32, #tpu.memory_space<vmem>>, vector<32x128xf32>
    %cst = arith.constant dense<0.000000e+00> : vector<8x128xf32>
    %3 = tpu.matmul %0, %2, %cst {dimension_numbers = #tpu.dot_dimension_numbers<[1], [0], [0], [1], [0, 0, 1, 1], [], []>} : vector<8x32xf32>, vector<32x128xf32>, vector<8x128xf32> -> vector<8x128xf32>
    %c0_5 = arith.constant 0 : index
    %c0_6 = arith.constant 0 : index
    %4 = vector.load %arg5[%c0_5, %c0_6] : memref<1x128xf32, #tpu.memory_space<vmem>>, vector<1x128xf32>
    %5 = vector.broadcast %4 : vector<1x128xf32> to vector<8x128xf32>
    %6 = arith.addf %3, %5 : vector<8x128xf32>
    %c0_7 = arith.constant 0 : index
    %c0_8 = arith.constant 0 : index
    %7 = vector.load %arg6[%c0_7, %c0_8] : memref<32x128xf32, #tpu.memory_space<vmem>>, vector<32x128xf32>
    %cst_9 = arith.constant dense<0.000000e+00> : vector<16x128xf32>
    %8 = tpu.matmul %1, %7, %cst_9 {dimension_numbers = #tpu.dot_dimension_numbers<[1], [0], [0], [1], [0, 0, 1, 1], [], []>} : vector<16x32xf32>, vector<32x128xf32>, vector<16x128xf32> -> vector<16x128xf32>
    %c0_10 = arith.constant 0 : index
    %c0_11 = arith.constant 0 : index
    %9 = vector.load %arg7[%c0_10, %c0_11] : memref<1x128xf32, #tpu.memory_space<vmem>>, vector<1x128xf32>
    %10 = vector.broadcast %9 : vector<1x128xf32> to vector<16x128xf32>
    %11 = arith.addf %8, %10 : vector<16x128xf32>
    %c0_12 = arith.constant 0 : index
    %c0_13 = arith.constant 0 : index
    %12 = vector.load %arg8[%c0_12, %c0_13] : memref<32x32xf32, #tpu.memory_space<vmem>>, vector<32x32xf32>
    %cst_14 = arith.constant dense<0.000000e+00> : vector<16x32xf32>
    %13 = tpu.matmul %1, %12, %cst_14 {dimension_numbers = #tpu.dot_dimension_numbers<[1], [0], [0], [1], [0, 0, 1, 1], [], []>} : vector<16x32xf32>, vector<32x32xf32>, vector<16x32xf32> -> vector<16x32xf32>
    %c0_15 = arith.constant 0 : index
    %c0_16 = arith.constant 0 : index
    %14 = vector.load %arg9[%c0_15, %c0_16] : memref<1x32xf32, #tpu.memory_space<vmem>>, vector<1x32xf32>
    %15 = vector.broadcast %14 : vector<1x32xf32> to vector<16x32xf32>
    %16 = arith.addf %13, %15 : vector<16x32xf32>
    %17 = vector.shape_cast %6 : vector<8x128xf32> to vector<1x8x128xf32>
    %18 = vector.shape_cast %11 : vector<16x128xf32> to vector<1x16x128xf32>
    %cst_17 = arith.constant dense<0.000000e+00> : vector<1x8x16xf32>
    %19 = tpu.matmul %17, %18, %cst_17 {dimension_numbers = #tpu.dot_dimension_numbers<[2], [2], [1], [1], [0, 0, 0, 1, 1, 1], [0], [0]>} : vector<1x8x128xf32>, vector<1x16x128xf32>, vector<1x8x16xf32> -> vector<1x8x16xf32>
    %20 = arith.mulf %17, %17 : vector<1x8x128xf32>
    %cst_18 = arith.constant dense<0.000000e+00> : vector<1x8xf32>
    %21 = vector.multi_reduction <add>, %20, %cst_18 [2] : vector<1x8x128xf32> to vector<1x8xf32>
    %22 = vector.shape_cast %21 : vector<1x8xf32> to vector<1x8x1xf32>
    %23 = arith.mulf %18, %18 : vector<1x16x128xf32>
    %cst_19 = arith.constant dense<0.000000e+00> : vector<1x16xf32>
    %24 = vector.multi_reduction <add>, %23, %cst_19 [2] : vector<1x16x128xf32> to vector<1x16xf32>
    %25 = vector.shape_cast %24 : vector<1x16xf32> to vector<1x1x16xf32>
    %26 = vector.broadcast %22 : vector<1x8x1xf32> to vector<1x8x16xf32>
    %27 = vector.broadcast %25 : vector<1x1x16xf32> to vector<1x8x16xf32>
    %28 = arith.mulf %26, %27 : vector<1x8x16xf32>
    %cst_20 = arith.constant 9.99999996E-13 : f32
    %29 = vector.broadcast %cst_20 : f32 to vector<1x8x16xf32>
    %30 = arith.maximumf %28, %29 : vector<1x8x16xf32>
    %31 = math.rsqrt %30 : vector<1x8x16xf32>
    %32 = arith.mulf %19, %31 : vector<1x8x16xf32>
    %c0_21 = arith.constant 0 : index
    %c0_22 = arith.constant 0 : index
    %c0_23 = arith.constant 0 : index
    %33 = vector.load %arg3[%c0_21, %c0_22, %c0_23] : memref<1x1x16xf32, #tpu.memory_space<vmem>>, vector<1x1x16xf32>
    %34 = vector.broadcast %33 : vector<1x1x16xf32> to vector<1x8x16xf32>
    %35 = arith.addf %32, %34 : vector<1x8x16xf32>
    %cst_24 = arith.constant dense<0xFF800000> : vector<1x8xf32>
    %36 = vector.multi_reduction <maximumf>, %35, %cst_24 [2] : vector<1x8x16xf32> to vector<1x8xf32>
    %37 = vector.shape_cast %36 : vector<1x8xf32> to vector<1x8x1xf32>
    %38 = vector.broadcast %37 : vector<1x8x1xf32> to vector<1x8x16xf32>
    %39 = arith.subf %35, %38 : vector<1x8x16xf32>
    %40 = math.exp %39 : vector<1x8x16xf32>
    %cst_25 = arith.constant dense<0.000000e+00> : vector<1x8xf32>
    %41 = vector.multi_reduction <add>, %40, %cst_25 [2] : vector<1x8x16xf32> to vector<1x8xf32>
    %42 = vector.shape_cast %41 : vector<1x8xf32> to vector<1x8x1xf32>
    %43 = tpu.reciprocal %42 {approx = true} : vector<1x8x1xf32> -> vector<1x8x1xf32>
    %44 = vector.broadcast %43 : vector<1x8x1xf32> to vector<1x8x16xf32>
    %45 = arith.mulf %40, %44 : vector<1x8x16xf32>
    %46 = vector.shape_cast %16 : vector<16x32xf32> to vector<1x16x32xf32>
    %cst_26 = arith.constant dense<0.000000e+00> : vector<1x8x32xf32>
    %47 = tpu.matmul %45, %46, %cst_26 {dimension_numbers = #tpu.dot_dimension_numbers<[2], [1], [1], [2], [0, 0, 0, 1, 1, 2], [0], [0]>} : vector<1x8x16xf32>, vector<1x16x32xf32>, vector<1x8x32xf32> -> vector<1x8x32xf32>
    %48 = vector.shape_cast %47 : vector<1x8x32xf32> to vector<8x32xf32>
    %c0_27 = arith.constant 0 : index
    %c0_28 = arith.constant 0 : index
    %49 = vector.load %arg10[%c0_27, %c0_28] : memref<32x32xf32, #tpu.memory_space<vmem>>, vector<32x32xf32>
    %cst_29 = arith.constant dense<0.000000e+00> : vector<8x32xf32>
    %50 = tpu.matmul %48, %49, %cst_29 {dimension_numbers = #tpu.dot_dimension_numbers<[1], [0], [0], [1], [0, 0, 1, 1], [], []>} : vector<8x32xf32>, vector<32x32xf32>, vector<8x32xf32> -> vector<8x32xf32>
    %c0_30 = arith.constant 0 : index
    %c0_31 = arith.constant 0 : index
    %51 = vector.load %arg11[%c0_30, %c0_31] : memref<1x32xf32, #tpu.memory_space<vmem>>, vector<1x32xf32>
    %52 = vector.broadcast %51 : vector<1x32xf32> to vector<8x32xf32>
    %53 = arith.addf %50, %52 : vector<8x32xf32>
    %c0_32 = arith.constant 0 : index
    %c0_33 = arith.constant 0 : index
    %54 = vector.load %arg12[%c0_32, %c0_33] : memref<8x32xf32, #tpu.memory_space<vmem>>, vector<8x32xf32>
    tpu.vector_store %arg12[%c0_32, %c0_33], %53 {strides = array<i32>} : memref<8x32xf32, #tpu.memory_space<vmem>>, vector<8x32xf32>,
    return
  }
  func.func @transform_0(%arg0: i32) -> (i32, i32) {
    %c0_i32 = arith.constant 0 : i32
    %c0_i32_0 = arith.constant 0 : i32
    return %arg0, %c0_i32 : i32, i32
  }
  func.func @transform_1(%arg0: i32) -> (i32, i32) {
    %c0_i32 = arith.constant 0 : i32
    %c0_i32_0 = arith.constant 0 : i32
    return %arg0, %c0_i32 : i32, i32
  }
  func.func @transform_2(%arg0: i32) -> (i32, i32, i32) {
    %c0_i32 = arith.constant 0 : i32
    %c0_i32_0 = arith.constant 0 : i32
    %c0_i32_1 = arith.constant 0 : i32
    return %arg0, %c0_i32, %c0_i32_0 : i32, i32, i32
  }
  func.func @transform_3(%arg0: i32) -> (i32, i32) {
    %c0_i32 = arith.constant 0 : i32
    %c0_i32_0 = arith.constant 0 : i32
    %c0_i32_1 = arith.constant 0 : i32
    return %c0_i32, %c0_i32_0 : i32, i32
  }
  func.func @transform_4(%arg0: i32) -> (i32, i32) {
    %c0_i32 = arith.constant 0 : i32
    %c0_i32_0 = arith.constant 0 : i32
    %c0_i32_1 = arith.constant 0 : i32
    return %c0_i32, %c0_i32_0 : i32, i32
  }
  func.func @transform_5(%arg0: i32) -> (i32, i32) {
    %c0_i32 = arith.constant 0 : i32
    %c0_i32_0 = arith.constant 0 : i32
    %c0_i32_1 = arith.constant 0 : i32
    return %c0_i32, %c0_i32_0 : i32, i32
  }
  func.func @transform_6(%arg0: i32) -> (i32, i32) {
    %c0_i32 = arith.constant 0 : i32
    %c0_i32_0 = arith.constant 0 : i32
    %c0_i32_1 = arith.constant 0 : i32
    return %c0_i32, %c0_i32_0 : i32, i32
  }
  func.func @transform_7(%arg0: i32) -> (i32, i32) {
    %c0_i32 = arith.constant 0 : i32
    %c0_i32_0 = arith.constant 0 : i32
    %c0_i32_1 = arith.constant 0 : i32
    return %c0_i32, %c0_i32_0 : i32, i32
  }
  func.func @transform_8(%arg0: i32) -> (i32, i32) {
    %c0_i32 = arith.constant 0 : i32
    %c0_i32_0 = arith.constant 0 : i32
    %c0_i32_1 = arith.constant 0 : i32
    return %c0_i32, %c0_i32_0 : i32, i32
  }
  func.func @transform_9(%arg0: i32) -> (i32, i32) {
    %c0_i32 = arith.constant 0 : i32
    %c0_i32_0 = arith.constant 0 : i32
    %c0_i32_1 = arith.constant 0 : i32
    return %c0_i32, %c0_i32_0 : i32, i32
  }
  func.func @transform_10(%arg0: i32) -> (i32, i32) {
    %c0_i32 = arith.constant 0 : i32
    %c0_i32_0 = arith.constant 0 : i32
    %c0_i32_1 = arith.constant 0 : i32
    return %c0_i32, %c0_i32_0 : i32, i32
  }
  func.func @transform_11(%arg0: i32) -> (i32, i32) {
    %c0_i32 = arith.constant 0 : i32
    %c0_i32_0 = arith.constant 0 : i32
    return %arg0, %c0_i32 : i32, i32
  }
}

</mosaic_0001>

<bundles_post_ra>
// kernel: tpu_custom_call.1
= control target key start
LH: loop header
LB: loop body
LE: loop exit
PB: predicated region body
PF: predicated region fallthrough
CT: control target
= control target key end

     0   :  { %s2611_s0 = inlined_call_operand.hbm [shape: f32[16,32], index: 0, kind: input, shape index: {}]   ;;  %s2612_s1 = inlined_call_operand.hbm [shape: f32[32,32], index: 1, kind: input, shape index: {}]   ;;  %s2613_s2 = inlined_call_operand.hbm [shape: f32[2,1,16], index: 2, kind: input, shape index: {}]   ;;  %s2614_s3 = inlined_call_operand.hbm [shape: f32[32,128], index: 3, kind: input, shape index: {}]   ;;  %s2615_s4 = inlined_call_operand.hbm [shape: f32[1,128], index: 4, kind: input, shape index: {}]   ;;  %s2616_s5 = inlined_call_operand.hbm [shape: f32[32,128], index: 5, kind: input, shape index: {}]   ;;  %s2617_s6 = inlined_call_operand.hbm [shape: f32[1,128], index: 6, kind: input, shape index: {}]   ;;  %s2618_s7 = inlined_call_operand.hbm [shape: f32[32,32], index: 7, kind: input, shape index: {}]   ;;  %s2619_s8 = inlined_call_operand.hbm [shape: f32[1,32], index: 8, kind: input, shape index: {}]   ;;  %s2620_s9 = inlined_call_operand.hbm [shape: f32[32,32], index: 9, kind: input, shape index: {}]   ;;  %s2621_s10 = inlined_call_operand.hbm [shape: f32[1,32], index: 10, kind: input, shape index: {}]   ;;  %s2622_s11 = inlined_call_operand.hbm [shape: f32[16,32], index: 11, kind: output, shape index: {}]  }
   0x1   :  { %2644 = sst [smem:[#allocation33_spill]] %s2612_s1 }
   0x2   :  { %2645 = sst [smem:[#allocation34_spill]] %s2613_s2 }
   0x3   :  { %2646 = sst [smem:[#allocation35_spill]] %s2614_s3 }
   0x4   :  { %2647 = sst [smem:[#allocation36_spill]] %s2616_s5 }
   0x5   :  { %2648 = sst [smem:[#allocation37_spill]] %s2618_s7 }
   0x6   :  { %2649 = sst [smem:[#allocation38_spill]] %s2620_s9 }
   0x7   :  { %2650 = sst [smem:[#allocation39_spill]] %s2622_s11 }
   0x8   :  { %16 = vsyncpa [#allocation3], 0 }
   0x9   :  { %18 = vsyncpa [#allocation3 + $0x1], 0 }
   0xa   :  { %19 = vsyncpa [#allocation6], 0 }
   0xb   :  { %21 = vsyncpa [#allocation6 + $0x1], 0 }
   0xc   :  { %22 = vsyncpa [#allocation9], 0 }
   0xd   :  { %23 = vsyncpa [#allocation12], 0 }
   0xe   :  { %24 = vsyncpa [#allocation15], 0 }
   0xf   :  { %25 = vsyncpa [#allocation18], 0 }
  0x10   :  { %26 = vsyncpa [#allocation4], 0 }
  0x11   :  { %28 = vsyncpa [#allocation4 + $0x1], 0  ;;  %s2130_s17 = smov 0   ;;  %s2132_s18 = smov 0  }
  0x12   :  { %s2134_s19 = smov 0   ;;  %s2136_s20 = smov 0  }
  0x13 LB: > { %2651 = sst [smem:[#allocation28_spill]] %s2047_s19  ;;  %s2053_s21 = smov [#allocation8]   ;;  %s2051_s20 = sphi %s2136_s20, %s2694_s20   ;;  %s2047_s19 = sphi %s2134_s19, %s2696_s19   ;;  %s2043_s18 = sphi %s2132_s18, %s2698_s18   ;;  %s2039_s17 = sphi %s2130_s17, %s2697_s17  }
  0x14   : > { %s323_s22 = sshll.u32 %s2053_s21, 4  ;;  %s2151_s23 = sadd.s32 4294967295, %s2051_s20   ;;  %s2156_s22 = int_to_ptr.vmem [resolvable:$true] %s323_s22 }
  0x15   : > { %p1338_p0 = scmp.ge.s32.totalorder %s2051_s20, 1  ;;  %p2626_p1 = scmp.eq.s32.totalorder %s2151_s23, 0 }
  0x16   : > { %p311_p2 = scmp.lt.s32.totalorder %s2051_s20, 3  ;;  %s2054_s25 = smov [#allocation11]  }
  0x17   : > { %s347_s26 = sshll.u32 %s2054_s25, 4  ;;  %s2055_s28 = smov [#allocation14]   ;;  %s2171_s26 = int_to_ptr.vmem [resolvable:$true] %s347_s26 }
  0x18   : > { %p2158_p3 = pnand %p1338_p0, %p311_p2  ;;  %s371_s29 = sshll.u32 %s2055_s28, 4  ;;  %s2173_s29 = int_to_ptr.vmem [resolvable:$true] %s371_s29 }
  0x19   : > { %s2655_s3 = sld [smem:[#allocation35_spill]] }
  0x1a   : > { %s2652_s24 = scalar_select %p2158_p3, 1, 0 }
  0x1b   : > { %p1543_p5 = pneg %p2158_p3 }
  0x1c   : > { %2653 = sst [smem:[#allocation29_spill]] %s2652_s24 }
  0x1d   : > { %p2167_p6 = pnand %p1543_p5, %p2626_p1 }
  0x1f   : > { %s2654_s27 = scalar_select %p2167_p6, 1, 0 }
  0x20   : > { %s1651_s13 = scalar_lea.hbm %s2655_s3, 512  ;;  %p2183_p8 = pneg %p2167_p6 }
  0x21   : > { %p1652_p7 = scmp.ne.s32.totalorder %s2655_s3, %s1651_s13  ;;  %p1658_p11 = scmp.lt.u32.totalorder %s1651_s13, %s2655_s3 }
  0x22   : > { %s2656_s16 = scalar_select %p2183_p8, 1, 0 }
  0x23   : > { %p1654_p9 = pnand %p2183_p8, %p1652_p7 }
  0x25   : > { %p1655_p10 = pneg %p1654_p9 }
  0x27   : > { %p1660_p12 = pnand %p1658_p11, %p1655_p10 }
  0x29   : > { %1663 = shalt.err (!%p1660_p12)
}
  0x2a   : > { %s1664_s28 = scalar_lea.vmem %s2156_s22, 512  ;;  %p1672_p5 = scmp.lt.s32.totalorder %s2156_s22, %s2156_s22 }
  0x2b   : > { %p1665_p13 = scmp.ne.s32.totalorder %s2156_s22, %s1664_s28  ;;  %p1673_p4 = scmp.lt.s32.totalorder %s1664_s28, %s1664_s28 }
  0x2d   : > { %p1667_p0 = pnand %p1665_p13, %p2183_p8  ;;  %p1674_p7 = por %p1673_p4, %p1672_p5 }
  0x2f   : > { %p1668_p2 = pneg %p1667_p0 }
  0x31   : > { %p1675_p9 = pnand %p1674_p7, %p1668_p2 }
  0x33   : > { %1678 = shalt.err (!%p1675_p9)
}
  0x34   : > { %s2628_s30 = smov 128   ;;  %s2629_s12 = smov 8  }
  0x35   : > { %1546 = dma.hbm_to_vmem [thread:$0]  (!%p2167_p6), %s2655_s3, 512, %s2156_s22, [#allocation9], %s2628_s30, %s2628_s30, %s2629_s12  }
  0x36   : > { %s2657_s5 = sld [smem:[#allocation36_spill]] }
  0x3c   : > { %s1679_s25 = scalar_lea.hbm %s2657_s5, 512 }
  0x3d   : > { %p1680_p4 = scmp.ne.s32.totalorder %s2657_s5, %s1679_s25  ;;  %p1686_p12 = scmp.lt.u32.totalorder %s1679_s25, %s2657_s5 }
  0x3f   : > { %p1682_p10 = pnand %p1680_p4, %p2183_p8 }
  0x41   : > { %p1683_p11 = pneg %p1682_p10 }
  0x43   : > { %p1688_p13 = pnand %p1686_p12, %p1683_p11 }
  0x45   : > { %1691 = shalt.err (!%p1688_p13)
}
  0x46   : > { %s1692_s22 = scalar_lea.vmem %s2171_s26, 512  ;;  %p1700_p7 = scmp.lt.s32.totalorder %s2171_s26, %s2171_s26 }
  0x47   : > { %p1693_p0 = scmp.ne.s32.totalorder %s2171_s26, %s1692_s22  ;;  %p1701_p9 = scmp.lt.s32.totalorder %s1692_s22, %s1692_s22 }
  0x49   : > { %p1695_p2 = pnand %p1693_p0, %p2183_p8  ;;  %p1702_p4 = por %p1701_p9, %p1700_p7 }
  0x4b   : > { %p1696_p5 = pneg %p1695_p2 }
  0x4d   : > { %p1703_p10 = pnand %p1702_p4, %p1696_p5 }
  0x4f   : > { %1706 = shalt.err (!%p1703_p10)
}
  0x50   : > { %1552 = dma.hbm_to_vmem [thread:$0]  (!%p2167_p6), %s2657_s5, 512, %s2171_s26, [#allocation12], %s2628_s30, %s2628_s30, %s2629_s12  }
  0x51   : > { %s2658_s7 = sld [smem:[#allocation37_spill]] }
  0x57   : > { %s1707_s14 = scalar_lea.hbm %s2658_s7, 512 }
  0x58   : > { %p1708_p11 = scmp.ne.s32.totalorder %s2658_s7, %s1707_s14  ;;  %p1714_p0 = scmp.lt.u32.totalorder %s1707_s14, %s2658_s7 }
  0x5a   : > { %p1710_p12 = pnand %p1708_p11, %p2183_p8 }
  0x5c   : > { %p1711_p13 = pneg %p1710_p12 }
  0x5e   : > { %p1716_p2 = pnand %p1714_p0, %p1711_p13 }
  0x60   : > { %1719 = shalt.err (!%p1716_p2)
}
  0x61   : > { %s1720_s26 = scalar_lea.vmem %s2173_s29, 512  ;;  %p1728_p4 = scmp.lt.s32.totalorder %s2173_s29, %s2173_s29 }
  0x62   : > { %p1721_p5 = scmp.ne.s32.totalorder %s2173_s29, %s1720_s26  ;;  %p1729_p10 = scmp.lt.s32.totalorder %s1720_s26, %s1720_s26 }
  0x64   : > { %p1723_p7 = pnand %p1721_p5, %p2183_p8  ;;  %p1730_p11 = por %p1729_p10, %p1728_p4 }
  0x66   : > { %p1724_p9 = pneg %p1723_p7 }
  0x68   : > { %p1731_p12 = pnand %p1730_p11, %p1724_p9 }
  0x6a   : > { %1734 = shalt.err (!%p1731_p12)
}
  0x6b   : > { %1558 = dma.hbm_to_vmem [thread:$0]  (!%p2167_p6), %s2658_s7, 512, %s2173_s29, [#allocation15], %s2628_s30, %s2628_s30, %s2629_s12  }
  0x6c   : > { %s2058_s11 = smov [#allocation17]   ;;  %s2659_s9 = sld [smem:[#allocation38_spill]] }
  0x6d   : > { %s395_s24 = sshll.u32 %s2058_s11, 4  ;;  %s396_s24 = int_to_ptr.vmem [resolvable:$true] %s395_s24 }
  0x72   : > { %s1735_s15 = scalar_lea.hbm %s2659_s9, 512 }
  0x73   : > { %p1736_p13 = scmp.ne.s32.totalorder %s2659_s9, %s1735_s15  ;;  %p1742_p5 = scmp.lt.u32.totalorder %s1735_s15, %s2659_s9 }
  0x75   : > { %p1738_p0 = pnand %p1736_p13, %p2183_p8 }
  0x77   : > { %p1739_p2 = pneg %p1738_p0 }
  0x79   : > { %p1744_p7 = pnand %p1742_p5, %p1739_p2 }
  0x7b   : > { %1747 = shalt.err (!%p1744_p7)
}
  0x7c   : > { %s1748_s29 = scalar_lea.vmem %s396_s24, 512  ;;  %p1756_p11 = scmp.lt.s32.totalorder %s396_s24, %s396_s24 }
  0x7d   : > { %p1749_p9 = scmp.ne.s32.totalorder %s396_s24, %s1748_s29  ;;  %p1757_p12 = scmp.lt.s32.totalorder %s1748_s29, %s1748_s29 }
  0x7f   : > { %p1751_p4 = pnand %p1749_p9, %p2183_p8  ;;  %p1758_p1 = por %p1757_p12, %p1756_p11 }
  0x81   : > { %p1752_p10 = pneg %p1751_p4 }
  0x83   : > { %p1759_p3 = pnand %p1758_p1, %p1752_p10 }
  0x85   : > { %1762 = shalt.err (!%p1759_p3)
}
  0x86   : > { %1564 = dma.hbm_to_vmem [thread:$0]  (!%p2167_p6), %s2659_s9, 512, %s396_s24, [#allocation18], %s2628_s30, %s2628_s30, %s2629_s12  }
  0x87   : > { %s1337_s11 = sadd.s32 4294967294, %s2051_s20   ;;  %s2282_s13 = sadd.s32 1, %s2051_s20  }
  0x88   : > { %2660 = sst [smem:[#allocation30_spill]] %s2282_s13  ;;  %s38_s14 = ssub.s32 %s2051_s20, %s2282_s13 }
  0x89   : > { %s41_s15 = sadd.s32 1, %s2047_s19  ;;  %p39_p1 = scmp.eq.s32.totalorder %s38_s14, 0 }
  0x8a   : > { %p48_p3 = scmp.ne.s32.totalorder %s2047_s19, %s2043_s18  ;;  %p49_p13 = scmp.eq.s32.totalorder %s2051_s20, 0 }
  0x8b   : > { %p54_p0 = scmp.ne.s32.totalorder %s2043_s18, %s2039_s17  ;;  %p2662_p5 = scmp.eq.s32.totalorder %s2151_s23, 0 }
  0x8c   : > { %s2293_s21 = scalar_select %p39_p1, %s2047_s19, %s41_s15  }
  0x8d   : > { %p50_p2 = por %p49_p13, %p48_p3  ;;  %p2297_p7 = por %p2662_p5, %p54_p0 }
  0x8e   : > { %2661 = sst [smem:[#allocation31_spill]] %s2293_s21  ;;  %p298_p9 = scmp.eq.s32.totalorder %s2151_s23, 1 }
  0x8f   : > { %s2663_s25 = scalar_select %p2297_p7, 1, 0 }
  0x90   : > { %p304_p4 = scmp.eq.s32.totalorder %s1337_s11, 1  ;;  %p1590_p10 = scmp.lt.s32.totalorder %s2051_s20, 2 }
  0x91   : > { %s2304_s24 = sand.u32 1, %s2047_s19   ;;  %p2306_p11 = por %p298_p9, %p48_p3 }
  0x92   : > { %p2310_p12 = por %p304_p4, %p54_p0  ;;  %p2314_p1 = pnand %p1590_p10, %p50_p2 }
  0x93   : > { %s2664_s28 = scalar_select %p2306_p11, 1, 0 }
  0x94   : > { %s2665_s26 = scalar_select %p2310_p12, 1, 0 }
  0x95   : > { %s2667_s29 = scalar_select %p2314_p1, 1, 0 }
  0x96   : > { %2666 = sst [smem:[#allocation32_spill]] %s2665_s26  ;;  %s438_s22 = sand.u32 1, %s2051_s20  }
  0x97   : > { %s1350_s2 = sshll.u32 %s2304_s24, 4  ;;  %s1382_s11 = sshll.u32 %s2051_s20, 8 }
  0x98   : > { %s442_s14 = scalar_lea.vmem [#allocation5], %s1350_s2  ;;  %s2668_s1 = sld [smem:[#allocation33_spill]] }
  0x99   : > { %s449_s15 = sshll.u32 %s442_s14, 4  ;;  %s2328_s5 = scalar_lea.sflag [#allocation6], %s438_s22  ;;  %s2326_s15 = int_to_ptr.vmem [resolvable:$true] %s449_s15 }
  0x9a   : > { %p2334_p13 = pneg %p2314_p1 }
  0x9c   : > { %s2669_s9 = scalar_select %p2334_p13, 1, 0 }
  0x9e   : > { %s2324_s3 = scalar_lea.hbm %s2668_s1, %s1382_s11  ;;  %s1768_s2 = scalar_lea.hbm %s2668_s1, 512 }
  0x9f   : > { %s1763_s7 = scalar_lea.hbm %s2324_s3, 256  ;;  %p1769_p5 = scmp.lt.u32.totalorder %s2324_s3, %s2668_s1 }
  0xa0   : > { %p1764_p3 = scmp.ne.s32.totalorder %s2324_s3, %s1763_s7  ;;  %p1770_p9 = scmp.lt.u32.totalorder %s1768_s2, %s1763_s7 }
  0xa1   : > { %p1772_p10 = scmp.lt.u32.totalorder %s1763_s7, %s2324_s3 }
  0xa2   : > { %p1766_p0 = pnand %p2334_p13, %p1764_p3  ;;  %p1771_p4 = por %p1770_p9, %p1769_p5 }
  0xa4   : > { %p1767_p2 = pneg %p1766_p0  ;;  %p1773_p12 = por %p1772_p10, %p1771_p4 }
  0xa6   : > { %p1774_p11 = pnand %p1773_p12, %p1767_p2 }
  0xa8   : > { %1777 = shalt.err (!%p1774_p11)
}
  0xa9   : > { %s1778_s22 = scalar_lea.vmem %s2326_s15, 256  ;;  %s2059_s30 = smov [#allocation5]  }
  0xaa   : > { %p1779_p3 = scmp.ne.s32.totalorder %s2326_s15, %s1778_s22  ;;  %s1783_s12 = sshll.u32 %s2059_s30, 4  ;;  %s1784_s12 = int_to_ptr.vmem [resolvable:$false] %s1783_s12 }
  0xab   : > { %s1785_s11 = scalar_lea.vmem %s1784_s12, 512  ;;  %p1786_p6 = scmp.lt.s32.totalorder %s2326_s15, %s1784_s12 }
  0xac   : > { %p1781_p0 = pnand %p1779_p3, %p2334_p13  ;;  %p1787_p8 = scmp.lt.s32.totalorder %s1785_s11, %s1778_s22 }
  0xae   : > { %p1782_p7 = pneg %p1781_p0  ;;  %p1788_p5 = por %p1787_p8, %p1786_p6 }
  0xb0   : > { %p1789_p9 = pnand %p1788_p5, %p1782_p7 }
  0xb2   : > { %1792 = shalt.err (!%p1789_p9)
}
  0xb3   : > { %s2670_s7 = smov 8   ;;  %s2671_s2 = smov 128  }
  0xb4   : > { %1574 = dma.hbm_to_vmem [thread:$0]  (!%p2314_p1), %s2324_s3, 256, %s2326_s15, %s2328_s5, %s2671_s2, %s2671_s2, %s2670_s7  }
  0xb5   : > { %s2060_s14 = smov [#allocation10]   ;;  %s2061_s30 = smov [#allocation13]  }
  0xb6   : > { %s337_s1 = sshll.u32 %s2060_s14, 4  ;;  %s361_s21 = sshll.u32 %s2061_s30, 4  ;;  %s338_s1 = int_to_ptr.vmem [resolvable:$true] %s337_s1  ;;  %s2361_s21 = int_to_ptr.vmem [resolvable:$true] %s361_s21 }
  0xb7   : > { %s1793_s11 = scalar_lea.hbm %s2615_s4, 16  ;;  %p2672_p8 = scmp.ne.s32.totalorder %s2656_s16, 0 }
  0xb8   : > { %p1794_p6 = scmp.ne.s32.totalorder %s2615_s4, %s1793_s11  ;;  %p1800_p12 = scmp.lt.u32.totalorder %s1793_s11, %s2615_s4 }
  0xba   : > { %p1796_p7 = pnand %p1794_p6, %p2672_p8 }
  0xbc   : > { %p1797_p11 = pneg %p1796_p7 }
  0xbe   : > { %p1802_p2 = pnand %p1800_p12, %p1797_p11 }
  0xc0   : > { %1805 = shalt.err (!%p1802_p2)
}
  0xc1   : > { %s1806_s15 = scalar_lea.vmem %s338_s1, 16  ;;  %s1813_s7 = scalar_lea.vmem %s338_s1, 32 }
  0xc2   : > { %p1807_p4 = scmp.ne.s32.totalorder %s338_s1, %s1806_s15  ;;  %p1814_p0 = scmp.lt.s32.totalorder %s338_s1, %s338_s1 }
  0xc3   : > { %p1815_p5 = scmp.lt.s32.totalorder %s1813_s7, %s1806_s15 }
  0xc4   : > { %p1809_p10 = pnand %p1807_p4, %p2672_p8 }
  0xc5   : > { %p1816_p9 = por %p1815_p5, %p1814_p0 }
  0xc6   : > { %p1810_p3 = pneg %p1809_p10 }
  0xc8   : > { %p1817_p1 = pnand %p1816_p9, %p1810_p3 }
  0xca   : > { %1820 = shalt.err (!%p1817_p1)
}
  0xcb   : > { %p2673_p6 = scmp.ne.s32.totalorder %s2654_s27, 0  ;;  %s1821_s14 = scalar_lea.hbm %s2617_s6, 16 }
  0xcc   : > { %p1822_p7 = scmp.ne.s32.totalorder %s2617_s6, %s1821_s14  ;;  %p1828_p1 = scmp.lt.u32.totalorder %s1821_s14, %s2617_s6 }
  0xcd   : > { %1549 = dma.hbm_to_vmem [thread:$0]  (!%p2673_p6), %s2615_s4, 16, %s338_s1, [#allocation9]  }
  0xce   : > { %p1824_p11 = pnand %p1822_p7, %p2672_p8 }
  0xd0   : > { %p1825_p12 = pneg %p1824_p11 }
  0xd2   : > { %p1830_p2 = pnand %p1828_p1, %p1825_p12 }
  0xd4   : > { %1833 = shalt.err (!%p1830_p2)
}
  0xd5   : > { %s1834_s1 = scalar_lea.vmem %s2361_s21, 16  ;;  %s1841_s3 = scalar_lea.vmem %s2361_s21, 32 }
  0xd6   : > { %p1835_p4 = scmp.ne.s32.totalorder %s2361_s21, %s1834_s1  ;;  %p1842_p0 = scmp.lt.s32.totalorder %s2361_s21, %s2361_s21 }
  0xd7   : > { %p1843_p5 = scmp.lt.s32.totalorder %s1841_s3, %s1834_s1 }
  0xd8   : > { %p1837_p10 = pnand %p1835_p4, %p2672_p8 }
  0xd9   : > { %p1844_p9 = por %p1843_p5, %p1842_p0 }
  0xda   : > { %p1838_p3 = pneg %p1837_p10 }
  0xdc   : > { %p1845_p7 = pnand %p1844_p9, %p1838_p3 }
  0xde   : > { %1848 = shalt.err (!%p1845_p7)
}
  0xdf   : > { %1555 = dma.hbm_to_vmem [thread:$0]  (!%p2673_p6), %s2617_s6, 16, %s2361_s21, [#allocation12]  }
  0xe0   : > { %s2062_s19 = smov [#allocation16]   ;;  %s2063_s26 = smov [#allocation19]  }
  0xe1   : > { %s385_s13 = sshll.u32 %s2062_s19, 4  ;;  %s409_s2 = sshll.u32 %s2063_s26, 4  ;;  %s386_s13 = int_to_ptr.vmem [resolvable:$true] %s385_s13  ;;  %s2405_s2 = int_to_ptr.vmem [resolvable:$true] %s409_s2 }
  0xe2   : > { %s1849_s22 = scalar_lea.hbm %s2619_s8, 16 }
  0xe3   : > { %p1850_p11 = scmp.ne.s32.totalorder %s2619_s8, %s1849_s22  ;;  %p1856_p2 = scmp.lt.u32.totalorder %s1849_s22, %s2619_s8 }
  0xe5   : > { %p1852_p12 = pnand %p1850_p11, %p2672_p8 }
  0xe7   : > { %p1853_p1 = pneg %p1852_p12 }
  0xe9   : > { %p1858_p4 = pnand %p1856_p2, %p1853_p1 }
  0xeb   : > { %1861 = shalt.err (!%p1858_p4)
}
  0xec   : > { %s1862_s3 = scalar_lea.vmem %s386_s13, 16  ;;  %s1869_s15 = scalar_lea.vmem %s386_s13, 32 }
  0xed   : > { %p1863_p10 = scmp.ne.s32.totalorder %s386_s13, %s1862_s3  ;;  %p1870_p5 = scmp.lt.s32.totalorder %s386_s13, %s386_s13 }
  0xee   : > { %p1871_p9 = scmp.lt.s32.totalorder %s1869_s15, %s1862_s3 }
  0xef   : > { %p1865_p3 = pnand %p1863_p10, %p2672_p8 }
  0xf0   : > { %p1872_p7 = por %p1871_p9, %p1870_p5 }
  0xf1   : > { %p1866_p0 = pneg %p1865_p3 }
  0xf3   : > { %p1873_p13 = pnand %p1872_p7, %p1866_p0 }
  0xf5   : > { %1876 = shalt.err (!%p1873_p13)
}
  0xf6   : > { %1561 = dma.hbm_to_vmem [thread:$0]  (!%p2673_p6), %s2619_s8, 16, %s386_s13, [#allocation15]  }
  0xf7   : > { %s1877_s30 = scalar_lea.hbm %s2621_s10, 16 }
  0xf8   : > { %p1878_p11 = scmp.ne.s32.totalorder %s2621_s10, %s1877_s30  ;;  %p1884_p13 = scmp.lt.u32.totalorder %s1877_s30, %s2621_s10 }
  0xfa   : > { %p1880_p12 = pnand %p1878_p11, %p2672_p8 }
  0xfc   : > { %p1881_p1 = pneg %p1880_p12 }
  0xfe   : > { %p1886_p2 = pnand %p1884_p13, %p1881_p1 }
 0x100   : > { %1889 = shalt.err (!%p1886_p2)
}
 0x101   : > { %s1890_s13 = scalar_lea.vmem %s2405_s2, 16  ;;  %s1897_s21 = scalar_lea.vmem %s2405_s2, 32 }
 0x102   : > { %p1891_p4 = scmp.ne.s32.totalorder %s2405_s2, %s1890_s13  ;;  %p1898_p0 = scmp.lt.s32.totalorder %s2405_s2, %s2405_s2 }
 0x103   : > { %p1899_p5 = scmp.lt.s32.totalorder %s1897_s21, %s1890_s13 }
 0x104   : > { %p1893_p10 = pnand %p1891_p4, %p2672_p8 }
 0x105   : > { %p1900_p9 = por %p1899_p5, %p1898_p0 }
 0x106   : > { %p1894_p3 = pneg %p1893_p10 }
 0x108   : > { %p1901_p7 = pnand %p1900_p9, %p1894_p3 }
 0x10a   : > { %1904 = shalt.err (!%p1901_p7)
}
 0x10b   : > { %1567 = dma.hbm_to_vmem [thread:$0]  (!%p2673_p6), %s2621_s10, 16, %s2405_s2, [#allocation18]  }
 0x10c   : > { %s1348_s16 = sshll.u32 %s2304_s24, 3  ;;  %s1349_s7 = sshll.u32 %s2051_s20, 7 }
 0x10d   : > { %s2454_s14 = scalar_lea.hbm %s2611_s0, %s1349_s7  ;;  %s424_s27 = scalar_lea.vmem [#allocation2], %s1348_s16 }
 0x10e   : > { %s431_s30 = sshll.u32 %s424_s27, 4  ;;  %s421_s22 = scalar_lea.sflag [#allocation3], %s2304_s24  ;;  %s432_s30 = int_to_ptr.vmem [resolvable:$true] %s431_s30 }
 0x10f   : > { %s1905_s12 = scalar_lea.hbm %s2454_s14, 128  ;;  %p2674_p11 = scmp.ne.s32.totalorder %s2669_s9, 0 }
 0x110   : > { %p1906_p8 = scmp.ne.s32.totalorder %s2454_s14, %s1905_s12  ;;  %s1910_s1 = scalar_lea.hbm %s2611_s0, 256 }
 0x111   : > { %p1911_p1 = scmp.lt.u32.totalorder %s2454_s14, %s2611_s0  ;;  %p1912_p13 = scmp.lt.u32.totalorder %s1910_s1, %s1905_s12 }
 0x112   : > { %p1908_p12 = pnand %p1906_p8, %p2674_p11  ;;  %p1914_p4 = scmp.lt.u32.totalorder %s1905_s12, %s2454_s14 }
 0x113   : > { %p1913_p2 = por %p1912_p13, %p1911_p1 }
 0x114   : > { %p1909_p6 = pneg %p1908_p12 }
 0x115   : > { %p1915_p10 = por %p1914_p4, %p1913_p2 }
 0x117   : > { %p1916_p3 = pnand %p1915_p10, %p1909_p6 }
 0x119   : > { %1919 = shalt.err (!%p1916_p3)
}
 0x11a   : > { %s1920_s3 = scalar_lea.vmem %s432_s30, 128  ;;  %s2064_s15 = smov [#allocation2]  }
 0x11b   : > { %p1921_p0 = scmp.ne.s32.totalorder %s432_s30, %s1920_s3  ;;  %s1925_s16 = sshll.u32 %s2064_s15, 4  ;;  %s1926_s16 = int_to_ptr.vmem [resolvable:$false] %s1925_s16 }
 0x11c   : > { %s1927_s7 = scalar_lea.vmem %s1926_s16, 256  ;;  %p1928_p7 = scmp.lt.s32.totalorder %s432_s30, %s1926_s16 }
 0x11d   : > { %p1923_p5 = pnand %p1921_p0, %p2674_p11  ;;  %p1929_p8 = scmp.lt.s32.totalorder %s1927_s7, %s1920_s3 }
 0x11f   : > { %p1924_p9 = pneg %p1923_p5  ;;  %p1930_p12 = por %p1929_p8, %p1928_p7 }
 0x121   : > { %p1931_p1 = pnand %p1930_p12, %p1924_p9 }
 0x123   : > { %1934 = shalt.err (!%p1931_p1)
}
 0x124   : > { %p2675_p13 = scmp.ne.s32.totalorder %s2667_s29, 0  ;;  %s1353_s19 = sshll.u32 %s2051_s20, 4 }
 0x125   : > { %s462_s26 = scalar_lea.vmem [#allocation7], %s2304_s24  ;;  %s2676_s11 = sld [smem:[#allocation34_spill]] }
 0x126   : > { %1571 = dma.hbm_to_vmem [thread:$0]  (!%p2675_p13), %s2454_s14, 128, %s432_s30, %s421_s22  }
 0x127   : > { %s469_s27 = sshll.u32 %s462_s26, 4  ;;  %s470_s27 = int_to_ptr.vmem [resolvable:$true] %s469_s27 }
 0x12b   : > { %s467_s1 = scalar_lea.hbm %s2676_s11, %s1353_s19  ;;  %s1940_s15 = scalar_lea.hbm %s2676_s11, 32 }
 0x12c   : > { %s1935_s13 = scalar_lea.hbm %s467_s1, 16  ;;  %p1941_p10 = scmp.lt.u32.totalorder %s467_s1, %s2676_s11 }
 0x12d   : > { %p1936_p6 = scmp.ne.s32.totalorder %s467_s1, %s1935_s13  ;;  %p1942_p3 = scmp.lt.u32.totalorder %s1940_s15, %s1935_s13 }
 0x12e   : > { %p1944_p5 = scmp.lt.u32.totalorder %s1935_s13, %s467_s1 }
 0x12f   : > { %p1938_p2 = pnand %p1936_p6, %p2674_p11  ;;  %p1943_p0 = por %p1942_p3, %p1941_p10 }
 0x131   : > { %p1939_p4 = pneg %p1938_p2  ;;  %p1945_p9 = por %p1944_p5, %p1943_p0 }
 0x133   : > { %p1946_p7 = pnand %p1945_p9, %p1939_p4 }
 0x135   : > { %1949 = shalt.err (!%p1946_p7)
}
 0x136   : > { %s1950_s24 = scalar_lea.vmem %s470_s27, 16  ;;  %s2065_s14 = smov [#allocation7]  }
 0x137   : > { %p1951_p8 = scmp.ne.s32.totalorder %s470_s27, %s1950_s24  ;;  %s1955_s30 = sshll.u32 %s2065_s14, 4  ;;  %s1956_s30 = int_to_ptr.vmem [resolvable:$false] %s1955_s30 }
 0x138   : > { %s1957_s22 = scalar_lea.vmem %s1956_s30, 32  ;;  %p1958_p6 = scmp.lt.s32.totalorder %s470_s27, %s1956_s30 }
 0x139   : > { %p1953_p12 = pnand %p1951_p8, %p2674_p11  ;;  %p1959_p2 = scmp.lt.s32.totalorder %s1957_s22, %s1950_s24 }
 0x13b   : > { %p1954_p1 = pneg %p1953_p12  ;;  %p1960_p13 = por %p1959_p2, %p1958_p6 }
 0x13d   : > { %p1961_p3 = pnand %p1960_p13, %p1954_p1 }
 0x13f   : > { %1964 = shalt.err (!%p1961_p3)
}
 0x140   : > { %p2677_p10 = scmp.ne.s32.totalorder %s2667_s29, 0  ;;  %s2678_s19 = sld [smem:[#allocation29_spill]] }
 0x142   : > { %1577 = dma.hbm_to_vmem [thread:$0]  (!%p2677_p10), %s467_s1, 16, %s470_s27, %s2328_s5  }
 0x146   : > { %p2679_p4 = scmp.ne.s32.totalorder %s2678_s19, 0 }
 0x147   : > { %s2495_s9 = sand.u32 (!%p2679_p4), 1, %s2043_s18   ;;  %p2680_p11 = scmp.ne.s32.totalorder (!%p2679_p4), %s2663_s25, 0 }
 0x148   : > { %478 = sbr.rel (%p2679_p4) target bundleno = 1558 (0x616), region = 64  ;;  %s1355_s26 = sshll.u32 (!%p2679_p4), %s2495_s9, 3 }
 0x149   : > { %s481_s12 = scalar_lea.sflag (!%p2679_p4), [#allocation3], %s2495_s9  ;;  %s2501_s2 = scalar_lea.vmem (!%p2679_p4), [#allocation2], %s1355_s26 }
 0x14f   : > { %2010 = dma.done.wait (%p2680_p11), %s481_s12, 128  }
 0x150   : > { %2012 = vsyncadd (%p2680_p11), %s481_s12, 4294967168  ;;  %s489_s5 = sand.u32 1, %s2151_s23   ;;  %s1356_s29 = sshll.u32 %s2495_s9, 4 }
 0x151   : > { %s490_s27 = scalar_lea.sflag [#allocation6], %s489_s5  ;;  %s2509_s1 = scalar_lea.vmem [#allocation5], %s1356_s29 }
 0x152   : > { %2014 = dma.done.wait (%p2680_p11), %s490_s27, 272  }
 0x153   : > { %2016 = vsyncadd (%p2680_p11), %s490_s27, 4294967024  ;;  %s501_s13 = scalar_lea.vmem [#allocation7], %s2495_s9  ;;  %p2681_p13 = scmp.eq.s32.totalorder %s2151_s23, 0 }
 0x155   : > { %2018 = dma.done.wait (%p2681_p13), [#allocation9], 528   ;;  %p2682_p0 = pmov %p2681_p13 }
 0x157   : > { %2020 = vsyncadd (%p2682_p0), [#allocation9], 4294966768  ;;  %p2683_p5 = pmov %p2682_p0 }
 0x158   : > { %p2684_p9 = pmov %p2682_p0 }
 0x159   : > { %2022 = dma.done.wait (%p2683_p5), [#allocation12], 528  }
 0x15a   : > { %2024 = vsyncadd (%p2684_p9), [#allocation12], 4294966768  ;;  %p2685_p7 = pmov %p2682_p0 }
 0x15b   : > { %p2686_p8 = pmov %p2682_p0 }
 0x15c   : > { %2026 = dma.done.wait (%p2685_p7), [#allocation15], 528  }
 0x15d   : > { %2028 = vsyncadd (%p2686_p8), [#allocation15], 4294966768  ;;  %p2687_p12 = pmov %p2682_p0 }
 0x15e   : > { %p2688_p1 = pmov %p2682_p0 }
 0x15f   : > { %2030 = dma.done.wait (%p2687_p12), [#allocation18], 528  }
 0x160   : > { %2032 = vsyncadd (%p2688_p1), [#allocation18], 4294966768  ;;  %v2066_v0 = vmov 0.0|0.0   ;;  %vm2067_vm0 = vmmov 0   ;;  %v2068_v1 = vmov 0.0   ;;  %vm596_vm1 = vcmask 261120  }
 0x161   : > { %1469 = vmatprep.subr.bf16.mxu0 %v2066_v0  ;;  %1419 = vmatprep.mubr.msk.f32.mxu0 %vm2067_vm0, %v2068_v1  ;;  %v670_v2 = vld [vmem:[#allocation11] sm:$0xff]  ;;  %v671_v3 = vld [vmem:[#allocation11 + $0x8] sm:$0xff]  ;;  %v672_v4 = vld [vmem:[#allocation11 + $0x10] sm:$0xff]  ;;  %v929_v36 = vlaneseq  ;;  %vm940_vm2 = vcmask 130112   ;;  %vm967_vm3 = vcmask 130048   ;;  %s1379_s25 = sshll.u32 %s2151_s23, 7 }
 0x162   : > { %v1475_v5 = vpack.c.bf16 %v671_v3, %v670_v2  ;;  %v673_v6 = vld [vmem:[#allocation11 + $0x18] sm:$0xff]  ;;  %v586_v10 = vld [vmem:[#allocation8 + $0x8] sm:$0xff]  ;;  %v587_v11 = vld [vmem:[#allocation8 + $0x10] sm:$0xff]  ;;  %s580_s21 = scalar_lea.vmem [#allocation20], %s1355_s26  ;;  %s2689_s7 = sld [smem:[#allocation39_spill]] }
 0x163   : > { %v583_v7 = vld [vmem:[%s2509_s1] sm:$0xff]  ;;  %v1479_v8 = vpack.c.bf16 %v673_v6, %v672_v4  ;;  %v584_v15 = vld [vmem:[%s2509_s1 + $0x8] sm:$0xff]  ;;  %v930_v37 = vand.u32 127, %v929_v36  ;;  %v932_v40 = vshrl.u32 %v929_v36, 7  ;;  %s1151_s3 = sshll.u32 %s580_s21, 4  ;;  %s1138_s14 = scalar_lea.sflag [#allocation4], %s2495_s9  ;;  %s2568_s3 = int_to_ptr.vmem [resolvable:$true] %s1151_s3 }
 0x164   : > { %1430 = vmatprep.mubr.msk.f32.mxu1 %vm596_vm1, %v583_v7  ;;  %v585_v9 = vld [vmem:[#allocation8] sm:$0xff]  ;;  %1476 = vmatprep.subr.bf16.mxu1 %v1475_v5  ;;  %v588_v13 = vld [vmem:[#allocation8 + $0x18] sm:$0xff]  ;;  %v763_v31 = vld [vmem:[#allocation14 + $0x8] sm:$0xff]  ;;  %s1965_s23 = scalar_lea.vmem %s2568_s3, 128  ;;  %p2690_p2 = scmp.ne.s32.totalorder %s2664_s28, 0 }
 0x165   : > { %v1470_v12 = vpack.c.bf16 %v586_v10, %v585_v9  ;;  %1478 = vmatpush3.bf16.msra.mxu1 %v1475_v5  ;;  %v1473_v14 = vpack.c.bf16 %v588_v13, %v587_v11  ;;  %v582_v16 = vld [vmem:[%s2501_s2] sm:$0xff]  ;;  %v1368_v17 = vld [vmem:[#allocation13] ss:$0 sm:$0xff]  ;;  %v1366_v18 = vld [vmem:[#allocation10] ss:$0 sm:$0xff]  ;;  %v935_v39 = vadd.s32 4294967288, %v930_v37  ;;  %v933_v43 = vsub.s32 %v930_v37, %v932_v40  ;;  %p1966_p6 = scmp.ne.s32.totalorder %s2568_s3, %s1965_s23 }
 0x166   : > { %1480 = vmatprep.subr.bf16.mxu1 %v1479_v8  ;;  %v762_v30 = vld [vmem:[#allocation14] sm:$0xff]  ;;  %v764_v32 = vld [vmem:[#allocation14 + $0x10] sm:$0xff]  ;;  %v765_v34 = vld [vmem:[#allocation14 + $0x18] sm:$0xff]  ;;  %s2069_s30 = smov [#allocation20]  }
 0x167   : > { %1471 = vmatpush3.bf16.msra.mxu0 %v1470_v12  ;;  %v1483_v33 = vpack.c.bf16 %v763_v31, %v762_v30  ;;  %v1487_v35 = vpack.c.bf16 %v765_v34, %v764_v32  ;;  %v938_v41 = vsub.s32 %v935_v39, %v932_v40  ;;  %v1374_v52 = vld [vmem:[%s501_s13] ss:$0 sm:$0xff]  ;;  %v1371_v63 = vld [vmem:[#allocation16] ss:$0 sm:$0xff]  ;;  %v1052_v5 = vld [vmem:[#allocation17] sm:$0xff]  ;;  %p1967_p3 = pnand %p1966_p6, %p2690_p2  ;;  %s1969_s22 = sshll.u32 %s2069_s30, 4  ;;  %s1970_s22 = int_to_ptr.vmem [resolvable:$false] %s1969_s22 }
 0x168   : > { %1472 = vmatprep.subr.bf16.mxu0 %v2066_v0  ;;  %v1053_v6 = vld [vmem:[#allocation17 + $0x8] sm:$0xff]  ;;  %v1055_v9 = vld [vmem:[#allocation17 + $0x18] sm:$0xff]  ;;  %s2566_s24 = scalar_lea.hbm %s2689_s7, %s1379_s25  ;;  %s1971_s19 = scalar_lea.vmem %s1970_s22, 256 }
 0x169   : > { %1482 = vmatpush3.bf16.msra.mxu1 %v1479_v8  ;;  %v1498_v8 = vpack.c.bf16 %v1053_v6, %v1052_v5  ;;  %p1968_p10 = pneg %p1967_p3  ;;  %p1972_p4 = scmp.lt.s32.totalorder %s2568_s3, %s1970_s22 }
 0x16a   : > { %1491 = vmatprep.subr.bf16.mxu1 %v2066_v0  ;;  %p1973_p11 = scmp.lt.s32.totalorder %s1971_s19, %s1965_s23 }
 0x16b   : > { %1474 = vmatpush3.bf16.msra.mxu0 %v1473_v14 }
 0x16c   : > { %1431 = vmatmul.mubr.msk.f32.vlgmr.msra.gmra.mrb[0].mxu1 %vm596_vm1, %v584_v15  ;;  %1484 = vmatprep.subr.bf16.mxu0 %v1483_v33  ;;  %p1974_p13 = por %p1973_p11, %p1972_p4 }
 0x16d   : > { %1448 = vmatprep.mubr.msk.f32.mxu1 %vm2067_vm0, %v2068_v1 }
 0x16e   : > { %1420 = vmatmul.mubr.msk.f32.vlgmr.msra.gmra.mrb[0].mxu0 %vm596_vm1, %v582_v16  ;;  %v1376_v16 = vld [vmem:[#allocation19] ss:$0 sm:$0xff]  ;;  %p1975_p0 = pnand %p1974_p13, %p1968_p10 }
 0x16f   : > { %1441 = vmatprep.mubr.msk.f32.mxu0 %vm596_vm1, %v583_v7  ;;  %1486 = vmatpush3.bf16.msra.mxu0 %v1483_v33  ;;  %v1054_v7 = vld [vmem:[#allocation17 + $0x10] sm:$0xff] }
 0x170   : > { %1488 = vmatprep.subr.bf16.mxu0 %v1487_v35  ;;  %v1501_v10 = vpack.c.bf16 %v1055_v9, %v1054_v7 }
 0x173   : > { %1490 = vmatpush3.bf16.msra.mxu0 %v1487_v35 }
 0x174   : > { %1494 = vmatprep.subr.bf16.mxu0 %v2066_v0 }
 0x176   : > { %1442 = vmatmul.mubr.msk.f32.vlgmr.msra.gmra.mrb[2].mxu0 %vm596_vm1, %v584_v15 }
 0x177   : > { %1455 = vmatprep.mubr.msk.f32.mxu0 %vm2067_vm0, %v2068_v1 }
 0x23f   : > { %v1432_v19 = vpop.f32.mrb[0].mxu1 }
 0x240   : > { %v759_v20 = vadd.f32 %v1432_v19, %v1368_v17  ;;  %v753_v21 = vpop.f32.mrb[1].mxu1 }
 0x241   : > { %v666_v22 = vpop.f32.mrb[0].mxu0  ;;  %v754_v23 = vadd.f32 %v1368_v17, %v753_v21 }
 0x242   : > { %v667_v24 = vadd.f32 %v1366_v18, %v666_v22  ;;  %v1421_v25 = vpop.f32.mrb[1].mxu0  ;;  %v922_v29 = vmul.f32 %v759_v20, %v759_v20 }
 0x243   : > { %v1492_v26 = vpack.c.bf16 %v759_v20, %v754_v23  ;;  %v921_v27 = vmul.f32 %v754_v23, %v754_v23 }
 0x244   : > { %v918_v28 = vmul.f32 %v667_v24, %v667_v24 }
 0x245   : > { %923 = vadd.xlane.f32.xlu0 %v921_v27  ;;  %1493 = vmatpush3.bf16.xpose.msra.mxu1 %v1492_v26 }
 0x246   : > { %919 = vadd.xlane.f32.xlu1 %v918_v28  ;;  %1497 = vmatprep.subr.bf16.mxu1 %v2066_v0 }
 0x249   : > { %925 = vadd.xlane.f32.xlu0 %v922_v29  ;;  %v1443_v62 = vpop.f32.mrb[2].mxu0 }
 0x24a   : > { %v845_v2 = vadd.f32 %v1443_v62, %v1371_v63 }
 0x24c   : > { %1449 = vmatmul.mubr.f32.vlgmr.msra.gmra.mrb[2].mxu1 %v667_v24 }
 0x24d   : > { %1466 = vmatprep.mubr.msk.f32.mxu1 %vm2067_vm0, %v2068_v1  ;;  %v839_v1 = vpop.f32.mrb[3].mxu0  ;;  %1499 = vmatpush3.bf16.msra.mxu1 %v1498_v8 }
 0x24e   : > { %v840_v3 = vadd.f32 %v1371_v63, %v839_v1  ;;  %1500 = vmatprep.subr.bf16.mxu1 %v2066_v0 }
 0x250   : > { %v1495_v4 = vpack.c.bf16 %v845_v2, %v840_v3 }
 0x251   : > { %1502 = vmatpush3.bf16.msra.mxu1 %v1501_v10 }
 0x252   : > { %1496 = vmatpush3.bf16.msra.mxu0 %v1495_v4 }
 0x2d2   : > { %v924_v38 = vpop.xlane.xlu0 %923 }
 0x2d3   : > { %v934_v45 = vrot.slane %v924_v38, %v933_v43  ;;  %v920_v47 = vpop.xlane.xlu1 %919 }
 0x2d6   : > { %v926_v42 = vpop.xlane.xlu0 %925 }
 0x2d7   : > { %v939_v44 = vrot.slane %v926_v42, %v938_v41 }
 0x2d9   : > { %v941_v46 = vsel %vm940_vm2, %v939_v44, %v934_v45 }
 0x2da   : > { %v955_v48 = vmul.f32 %v941_v46, %v920_v47 }
 0x2dc   : > { %v956_v49 = vmax.f32 %v955_v48, 1e-12 }
 0x2de   : > { %1645 = vrsqrt.f32 %v956_v49 }
 0x2e8   : > { %v1646_v50 = vpop.eup %1645 }
 0x31f   : > { %v914_v51 = vpop.f32.mrb[2].mxu1 }
 0x320   : > { %v958_v53 = vmul.f32 %v1646_v50, %v914_v51  ;;  %v1450_v54 = vpop.f32.mrb[3].mxu1 }
 0x322   : > { %v966_v55 = vadd.f32 %v1374_v52, %v958_v53 }
 0x324   : > { %v968_v56 = vsel %vm967_vm3, %v966_v55, -inf }
 0x325   : > { %969 = vmax.xlane.f32.xlu1 %v968_v56 }
 0x3b2   : > { %v970_v57 = vpop.xlane.xlu1 %969 }
 0x3b3   : > { %v971_v58 = vsub.f32 %v966_v55, %v970_v57 }
 0x3b5   : > { %v972_v59 = vmul.f32 1.442695, %v971_v58 }
 0x3b7   : > { %1647 = vpow2.f32 %v972_v59 }
 0x3c1   : > { %v1648_v60 = vpop.eup %1647 }
 0x3c2   : > { %v974_v61 = vsel %vm967_vm3, %v1648_v60, 0.0 }
 0x3c3   : > { %975 = vadd.xlane.f32.xlu0 %v974_v61 }
 0x450   : > { %v976_v11 = vpop.xlane.xlu0 %975 }
 0x451   : > { %1649 = vrcp.f32 %v976_v11 }
 0x45b   : > { %v1650_v12 = vpop.eup %1649 }
 0x45c   : > { %v978_v13 = vmul.f32 %v1650_v12, %v1648_v60 }
 0x45e   : > { %1456 = vmatmul.mubr.msk.f32.vlgmr.msra.gmra.mrb[4].mxu0 %vm967_vm3, %v978_v13 }
 0x531   : > { %v1048_v14 = vpop.f32.mrb[4].mxu0 }
 0x532   : > { %v1457_v15 = vpop.f32.mrb[5].mxu0  ;;  %1467 = vmatmul.mubr.msk.f32.vlgmr.msra.gmra.mrb[4].mxu1 %vm596_vm1, %v1048_v14 }
 0x605   : > { %v1132_v17 = vpop.f32.mrb[4].mxu1 }
 0x606   : > { %v1133_v0 = vadd.f32 %v1376_v16, %v1132_v17  ;;  %v1468_v18 = vpop.f32.mrb[5].mxu1 }
 0x608   : > { %1136 = vst.msk [vmem:[%s580_s21] sm:$0xff] %vm596_vm1, %v1133_v0 }
 0x609   : > { %1978 = shalt.err (!%p1975_p0)
}
 0x60a   : > { %s1979_s9 = scalar_lea.hbm %s2566_s24, 128  ;;  %s1983_s2 = scalar_lea.hbm %s2689_s7, 256 }
 0x60b   : > { %p1980_p5 = scmp.ne.s32.totalorder %s2566_s24, %s1979_s9  ;;  %p1984_p8 = scmp.lt.u32.totalorder %s2566_s24, %s2689_s7 }
 0x60c   : > { %p1985_p12 = scmp.lt.u32.totalorder %s1983_s2, %s1979_s9  ;;  %p1987_p6 = scmp.lt.u32.totalorder %s1979_s9, %s2566_s24 }
 0x60d   : > { %p1981_p9 = pnand %p1980_p5, %p2690_p2 }
 0x60e   : > { %p1986_p1 = por %p1985_p12, %p1984_p8 }
 0x60f   : > { %p1982_p7 = pneg %p1981_p9 }
 0x610   : > { %p1988_p3 = por %p1987_p6, %p1986_p1 }
 0x612   : > { %p1989_p10 = pnand %p1988_p3, %p1982_p7 }
 0x614   : > { %1992 = shalt.err (!%p1989_p10)
}
 0x615   : > { %1541 = dma.vmem_to_hbm [thread:$0]  (%p2690_p2), %s2568_s3, 128, %s2566_s24, %s1138_s14  }
 0x616 PF: > { %s2691_s27 = sld [smem:[#allocation32_spill]]  ;;  %s1163_s1 = sand.u32 1, %s2039_s17  }
 0x617   : > { %p2693_p11 = scmp.ge.s32.totalorder %s2051_s20, 2  ;;  %s1164_s13 = scalar_lea.sflag [#allocation4], %s1163_s1 }
 0x61c   : > { %p2692_p4 = scmp.ne.s32.totalorder %s2691_s27, 0 }
 0x61e   : > { %p1579_p13 = pnand %p2693_p11, %p2692_p4 }
 0x620   : > { %2034 = dma.done.wait (!%p1579_p13), %s1164_s13, 128  }
 0x621   : > { %2036 = vsyncadd (!%p1579_p13), %s1164_s13, 4294967168  ;;  %s2694_s20 = sld [smem:[#allocation30_spill]]  ;;  %s2695_s25 = sld [smem:[#allocation28_spill]] }
 0x622   : > { %s2696_s19 = sld [smem:[#allocation31_spill]]  ;;  %s2697_s17 = smov %s2043_s18 }
 0x627   : > { %p31_p0 = scmp.ge.s32.totalorder %s2694_s20, 4   ;;  %s2698_s18 = smov %s2695_s25 }
 0x629   :  { %33 = sbr.rel (!%p31_p0) target bundleno = 19 (0x13), region = 165 }
 0x630   :  { %1169 = vsyncpa [#allocation3], 1 }
 0x631   :  { %1171 = vsyncpa [#allocation3 + $0x1], 1 }
 0x632   :  { %1172 = vsyncpa [#allocation6], 1 }
 0x633   :  { %1174 = vsyncpa [#allocation6 + $0x1], 1 }
 0x634   :  { %1175 = vsyncpa [#allocation9], 1 }
 0x635   :  { %1176 = vsyncpa [#allocation12], 1 }
 0x636   :  { %1177 = vsyncpa [#allocation15], 1 }
 0x637   :  { %1178 = vsyncpa [#allocation18], 1 }
 0x638   :  { %1179 = vsyncpa [#allocation4], 1 }
 0x639   :  { %1181 = vsyncpa [#allocation4 + $0x1], 1 }

</bundles_post_ra>
